<compile_context>
chip_gen: v7x
topology: tpu7x:2x2x1
jax: 0.10.0
libtpu: 0.0.40
codegen_flags: <defaults>
</compile_context>

<pallas_src>
import jax
import jax.numpy as jnp
from jax.experimental import pallas as pl
from jax.experimental.pallas import tpu as pltpu


def _round_up(x: int, m: int) -> int:
    return ((x + m - 1) // m) * m


def _cdiv(a: int, b: int) -> int:
    return (a + b - 1) // b


def svnet_kernel(st_ref, w0t_ref, bias0_ref, acts_ref, out_ref):
    """One grid step over an M-block of flattened (sample, time) columns.

    st_ref   : (M_BLK, S) f32/bf16  states in native layout, row m = sample*(T+1)+t
    w0t_ref  : (A, S)     f32/bf16  option-0 weights, transposed (resident)
    bias0_ref: (A, 1)     f32       option-0 bias (resident)
    acts_ref : (1, M_BLK) i32       action per column; sentinel A marks invalid
    out_ref  : (1, 1, 1)  f32       per-block partial of -sum(logp)
    """
    st = st_ref[...]                                   # (M_BLK, S)
    w0t = w0t_ref[...]                                 # (A, S)

    # Lane-dense logits (A, M_BLK): contract S of both operands (NT matmul);
    # the implicit (M_BLK, S) -> (S, M_BLK) transpose uses the idle XLU.
    logits = jax.lax.dot_general(
        w0t, st, (((1,), (1,)), ((), ())),
        preferred_element_type=jnp.float32) + bias0_ref[...]   # (A, M_BLK) f32

    # log_softmax over actions = cheap sublane reduce over the A rows; all
    # elementwise/EUP work runs on lane-dense f32 vregs.
    m = jnp.max(logits, axis=0, keepdims=True)                  # (1, M_BLK)
    lse = m + jnp.log(jnp.sum(jnp.exp(logits - m), axis=0, keepdims=True))
    logp = logits - lse                                         # (A, M_BLK)

    # Fused gather + mask: invalid columns (t >= length, the action-less
    # t == max_T column, tile padding, and edge-block garbage rows of st)
    # carry the sentinel id A which never matches the iota, so they contribute
    # exactly 0 (jnp.where is a select; it does not propagate NaN/Inf from the
    # unselected branch).
    acts = acts_ref[...]                                        # (1, M_BLK)
    a_iota = jax.lax.broadcasted_iota(jnp.int32, logp.shape, 0)
    picked = jnp.where(a_iota == acts, logp, 0.0)               # (A, M_BLK)

    partial = jnp.sum(jnp.sum(picked, axis=0, keepdims=True),
                      axis=1, keepdims=True)                    # (1, 1)
    out_ref[0] = -partial   # per-block partial; summed outside the kernel

    # TODO(synk): routing this (1,1) partial through an SMEM-space output would
    # drop the width-1 masked vst; negligible once blocks carry ~2 MiB payload.
    # TODO(synk): total_correct / argmax accuracy is computed but never returned
    # by SVNet.forward; shrink_micro_net shrink_loss() branch not implemented.


def svnet_loss(s_i, W, bias, actions, lengths, *, num_b, num_a):
    """loss = -sum_i sum_{t<length_i} log_softmax(s_i[i,t] @ W + b)[opt 0][a_it]."""
    B, Tp1, S = s_i.shape
    max_T = Tp1 - 1
    A = num_a  # only option b = 0 (first A columns of W) is ever used by SVNet

    # Tiny resident operands: option-0 weights transposed (lane-friendly) in the
    # states dtype, bias kept f32 for the f32 softmax path.
    w0t = jnp.transpose(W[:, :A]).astype(s_i.dtype)          # (A, S)
    bias0 = bias[:A].astype(jnp.float32).reshape(A, 1)       # (A, 1)

    # Free reshape (contiguous) — no transpose, no pad, no cast: states stream
    # exactly once from HBM in their native layout/dtype.
    m_total = B * Tp1
    st = s_i.reshape(m_total, S)

    # ---- tiling: lane-dense M blocks, ~2 MiB payload per grid step ----------
    itemsize = jnp.dtype(s_i.dtype).itemsize
    payload_target = 2 * 1024 * 1024                 # amortizes ~0.35 us/step
    target_blk = max(128, (payload_target // (S * itemsize)) // 128 * 128)
    vmem_budget = 8 * 1024 * 1024                    # double-buffered states
    mblk_vmem = max(128, (vmem_budget // (2 * itemsize * S)) // 128 * 128)
    # Keep >= 2 blocks when there is enough work: both TensorCores on v7x.
    half = _round_up(_cdiv(m_total, 2), 128)
    m_blk = max(128, min(target_blk, mblk_vmem, half))
    m_pad = _round_up(m_total, m_blk)
    num_blocks = m_pad // m_blk

    # Per-column action id with sentinel A on every invalid column (t >= length,
    # the action-less t == max_T column, and flatten/tile padding).  Only this
    # tiny int32 row is padded; the states array is left untouched, and the
    # sentinel also neutralizes the undefined tail of the last (partial) block.
    lengths = jnp.minimum(lengths.astype(jnp.int32), max_T)  # PyTorch would index-error otherwise
    acts_pad = jnp.concatenate(
        [actions.astype(jnp.int32), jnp.full((B, 1), A, jnp.int32)], axis=1)  # (B, T+1)
    valid = (jnp.arange(Tp1, dtype=jnp.int32)[None, :] < lengths[:, None])
    acts_flat = jnp.where(valid, acts_pad, A).reshape(m_total)
    acts_flat = jnp.pad(acts_flat, (0, m_pad - m_total),
                        constant_values=A).reshape(1, m_pad)

    partials = pl.pallas_call(
        svnet_kernel,
        out_shape=jax.ShapeDtypeStruct((num_blocks, 1, 1), jnp.float32),
        grid_spec=pltpu.PrefetchScalarGridSpec(
            num_scalar_prefetch=0,
            grid=(num_blocks,),
            in_specs=[
                pl.BlockSpec((m_blk, S), lambda i: (i, 0)),   # states (streamed)
                # Constant (0, 0) index_map keeps W0^T / bias resident across
                # grid steps (no per-step re-DMA of the weights).
                pl.BlockSpec((A, S), lambda i: (0, 0)),       # W0^T (resident)
                pl.BlockSpec((A, 1), lambda i: (0, 0)),       # bias0 (resident)
                pl.BlockSpec((1, m_blk), lambda i: (0, i)),   # actions (streamed)
            ],
            out_specs=pl.BlockSpec((1, 1, 1), lambda i: (i, 0, 0)),
        ),
        # Per-block partials -> no shared accumulator -> the grid axis is safely
        # parallel (uses both TensorCores on v7x; harmless on v5e/v6e).
        compiler_params=pltpu.CompilerParams(
            dimension_semantics=("parallel",),
            vmem_limit_bytes=32 * 1024 * 1024),
    )(st, w0t, bias0, acts_flat)

    return jnp.sum(partials)


def svnet_loss_ref(s_i, W, bias, actions, lengths, *, num_b, num_a):
    """Pure-JAX reference replicating the PyTorch forward."""
    B, Tp1, S = s_i.shape
    logits = jnp.einsum("bts,sk->btk", s_i.astype(jnp.float32),
                        W.astype(jnp.float32)) + bias                # (B, T+1, b*A)
    logits = logits.reshape(B, Tp1, num_b, num_a)
    logps = jax.nn.log_softmax(logits, axis=-1)                      # action_logps
    total = 0.0
    for i in range(B):
        L = int(lengths[i])
        lp = logps[i, :L, 0, :]                                      # (L, A)
        sel = lp[jnp.arange(L), actions[i, :L]]
        total = total + jnp.sum(sel)
    return -total


if __name__ == "__main__":
    B, max_T, S = 2, 8, 32
    num_b, num_a = 2, 4                       # control_net.b = 2 options, 4 actions

    key = jax.random.PRNGKey(0)
    k_s, k_w, k_b, k_a = jax.random.split(key, 4)

    s_i = jax.random.normal(k_s, (B, max_T + 1, S), dtype=jnp.float32)
    W = jax.random.normal(k_w, (S, num_b * num_a), dtype=jnp.float32) * 0.1
    bias = jax.random.normal(k_b, (num_b * num_a,), dtype=jnp.float32) * 0.1
    actions = jax.random.randint(k_a, (B, max_T), 0, num_a, dtype=jnp.int32)
    lengths = jnp.array([max_T, 5], dtype=jnp.int32)

    loss = svnet_loss(s_i, W, bias, actions, lengths, num_b=num_b, num_a=num_a)
    loss = jax.block_until_ready(loss)

    ref = svnet_loss_ref(s_i, W, bias, actions, lengths, num_b=num_b, num_a=num_a)
    # 1e-3 tolerance: MXU f32 matmul precision may differ slightly from the
    # XLA einsum reference; masking/gather bugs would show up as O(1) errors.
    assert jnp.allclose(loss, ref, rtol=1e-3, atol=1e-3), (loss, ref)

    print("KERNEL_OK")
</pallas_src>

<mosaic_0001>
module attributes {stable_mosaic.version = 11 : i64} {
  func.func @svnet_kernel(%arg0: i32, %arg1: memref<128x32xf32, #tpu.memory_space<vmem>>, %arg2: memref<4x32xf32, #tpu.memory_space<vmem>>, %arg3: memref<4x1xf32, #tpu.memory_space<vmem>>, %arg4: memref<1x128xi32, #tpu.memory_space<vmem>>, %arg5: memref<1x1x1xf32, #tpu.memory_space<vmem>>) attributes {dimension_semantics = [#tpu.dimension_semantics<parallel>], iteration_bounds = array<i64: 1>, scalar_prefetch = 0 : i64, scratch_operands = 0 : i64, tpu.core_type = #tpu.core_type<tc>, window_params = [{transform_indices = @transform_0, window_bounds = array<i64: 128, 32>}, {pipeline_mode = #tpu.pipeline_mode<synchronous>, transform_indices = @transform_1, window_bounds = array<i64: 4, 32>}, {pipeline_mode = #tpu.pipeline_mode<synchronous>, transform_indices = @transform_2, window_bounds = array<i64: 4, 1>}, {transform_indices = @transform_3, window_bounds = array<i64: 1, 128>}, {transform_indices = @transform_4, window_bounds = array<i64: 1, 1, 1>}]} {
    %c0 = arith.constant 0 : index
    %c0_0 = arith.constant 0 : index
    %0 = vector.load %arg1[%c0, %c0_0] : memref<128x32xf32, #tpu.memory_space<vmem>>, vector<128x32xf32>
    %c0_1 = arith.constant 0 : index
    %c0_2 = arith.constant 0 : index
    %1 = vector.load %arg2[%c0_1, %c0_2] : memref<4x32xf32, #tpu.memory_space<vmem>>, vector<4x32xf32>
    %cst = arith.constant dense<0.000000e+00> : vector<4x128xf32>
    %2 = tpu.matmul %1, %0, %cst {dimension_numbers = #tpu.dot_dimension_numbers<[1], [1], [0], [0], [0, 0, 1, 0], [], []>} : vector<4x32xf32>, vector<128x32xf32>, vector<4x128xf32> -> vector<4x128xf32>
    %c0_3 = arith.constant 0 : index
    %c0_4 = arith.constant 0 : index
    %3 = vector.load %arg3[%c0_3, %c0_4] : memref<4x1xf32, #tpu.memory_space<vmem>>, vector<4x1xf32>
    %4 = vector.broadcast %3 : vector<4x1xf32> to vector<4x128xf32>
    %5 = arith.addf %2, %4 : vector<4x128xf32>
    %cst_5 = arith.constant dense<0xFF800000> : vector<128xf32>
    %6 = vector.multi_reduction <maximumf>, %5, %cst_5 [0] : vector<4x128xf32> to vector<128xf32>
    %7 = vector.shape_cast %6 : vector<128xf32> to vector<1x128xf32>
    %8 = vector.broadcast %7 : vector<1x128xf32> to vector<4x128xf32>
    %9 = arith.subf %5, %8 : vector<4x128xf32>
    %10 = math.exp %9 : vector<4x128xf32>
    %cst_6 = arith.constant dense<0.000000e+00> : vector<128xf32>
    %11 = vector.multi_reduction <add>, %10, %cst_6 [0] : vector<4x128xf32> to vector<128xf32>
    %12 = vector.shape_cast %11 : vector<128xf32> to vector<1x128xf32>
    %13 = math.log %12 : vector<1x128xf32>
    %14 = arith.addf %7, %13 : vector<1x128xf32>
    %15 = vector.broadcast %14 : vector<1x128xf32> to vector<4x128xf32>
    %16 = arith.subf %5, %15 : vector<4x128xf32>
    %c0_7 = arith.constant 0 : index
    %c0_8 = arith.constant 0 : index
    %17 = vector.load %arg4[%c0_7, %c0_8] : memref<1x128xi32, #tpu.memory_space<vmem>>, vector<1x128xi32>
    %18 = tpu.iota {dimensions = array<i32: 0>} : vector<4x128xi32>
    %19 = vector.broadcast %17 : vector<1x128xi32> to vector<4x128xi32>
    %20 = arith.cmpi eq, %18, %19 : vector<4x128xi32>
    %cst_9 = arith.constant 0.000000e+00 : f32
    %21 = vector.broadcast %cst_9 : f32 to vector<4x128xf32>
    %22 = arith.select %20, %16, %21 : vector<4x128xi1>, vector<4x128xf32>
    %cst_10 = arith.constant dense<0.000000e+00> : vector<128xf32>
    %23 = vector.multi_reduction <add>, %22, %cst_10 [0] : vector<4x128xf32> to vector<128xf32>
    %24 = vector.shape_cast %23 : vector<128xf32> to vector<1x128xf32>
    %cst_11 = arith.constant dense<0.000000e+00> : vector<1xf32>
    %25 = vector.multi_reduction <add>, %24, %cst_11 [1] : vector<1x128xf32> to vector<1xf32>
    %26 = vector.shape_cast %25 : vector<1xf32> to vector<1x1xf32>
    %cst_12 = arith.constant 0.000000e+00 : f32
    %27 = vector.broadcast %cst_12 : f32 to vector<1x1xf32>
    %28 = arith.subf %27, %26 : vector<1x1xf32>
    %c0_13 = arith.constant 0 : index
    %c0_14 = arith.constant 0 : index
    %c0_15 = arith.constant 0 : index
    %29 = vector.load %arg5[%c0_13, %c0_14, %c0_15] : memref<1x1x1xf32, #tpu.memory_space<vmem>>, vector<1x1x1xf32>
    %30 = vector.shape_cast %29 : vector<1x1x1xf32> to vector<1x1xf32>
    %31 = vector.shape_cast %28 : vector<1x1xf32> to vector<1x1x1xf32>
    tpu.vector_store %arg5[%c0_13, %c0_14, %c0_15], %31 {strides = array<i32>} : memref<1x1x1xf32, #tpu.memory_space<vmem>>, vector<1x1x1xf32>,
    return
  }
  func.func @transform_0(%arg0: i32) -> (i32, i32) {
    %c0_i32 = arith.constant 0 : i32
    %c0_i32_0 = arith.constant 0 : i32
    return %arg0, %c0_i32 : i32, i32
  }
  func.func @transform_1(%arg0: i32) -> (i32, i32) {
    %c0_i32 = arith.constant 0 : i32
    %c0_i32_0 = arith.constant 0 : i32
    %c0_i32_1 = arith.constant 0 : i32
    return %c0_i32, %c0_i32_0 : i32, i32
  }
  func.func @transform_2(%arg0: i32) -> (i32, i32) {
    %c0_i32 = arith.constant 0 : i32
    %c0_i32_0 = arith.constant 0 : i32
    %c0_i32_1 = arith.constant 0 : i32
    return %c0_i32, %c0_i32_0 : i32, i32
  }
  func.func @transform_3(%arg0: i32) -> (i32, i32) {
    %c0_i32 = arith.constant 0 : i32
    %c0_i32_0 = arith.constant 0 : i32
    return %c0_i32, %arg0 : i32, i32
  }
  func.func @transform_4(%arg0: i32) -> (i32, i32, i32) {
    %c0_i32 = arith.constant 0 : i32
    %c0_i32_0 = arith.constant 0 : i32
    %c0_i32_1 = arith.constant 0 : i32
    return %arg0, %c0_i32, %c0_i32_0 : i32, i32, i32
  }
}

</mosaic_0001>

<bundles_post_ra>
// kernel: tpu_custom_call.1
= control target key start
LH: loop header
LB: loop body
LE: loop exit
PB: predicated region body
PF: predicated region fallthrough
CT: control target
= control target key end

     0   :  { %9 = vsyncpa [#allocation3], 0  ;;  %s490_s0 = inlined_call_operand.hbm [shape: f32[18,32], index: 0, kind: input, shape index: {}]   ;;  %s491_s1 = inlined_call_operand.vmem [shape: f32[4,32], index: 1, kind: input, shape index: {}]   ;;  %s492_s2 = inlined_call_operand.vmem [shape: f32[4,1], index: 2, kind: input, shape index: {}]   ;;  %s493_s3 = inlined_call_operand.vmem [shape: s32[1,128], index: 3, kind: input, shape index: {}]   ;;  %s494_s4 = inlined_call_operand.hbm [shape: f32[1,1,1], index: 4, kind: output, shape index: {}]  }
   0x1   :  { %10 = vsyncpa [#allocation4], 0 }
   0x2   :  { %15 = vsyncadd [#allocation3], 1664  ;;  %s398_s15 = smov [#allocation2]   ;;  %s350_s19 = scalar_lea.hbm %s490_s0, 384 }
   0x3   :  { %s16_s16 = sshll.u32 %s398_s15, 4  ;;  %p351_p0 = scmp.ne.s32.totalorder %s490_s0, %s350_s19  ;;  %s17_s16 = int_to_ptr.vmem [resolvable:$true] %s16_s16 }
   0x4   :  { %p354_p1 = scmp.lt.u32.totalorder %s350_s19, %s490_s0 }
   0x6   :  { %p356_p2 = pnand %p354_p1, %p351_p0 }
   0x8   :  { %359 = shalt.err (!%p356_p2)
}
   0x9   :  { %s360_s24 = scalar_lea.vmem %s17_s16, 384  ;;  %s364_s25 = scalar_lea.vmem %s17_s16, 2048 }
   0xa   :  { %p361_p3 = scmp.ne.s32.totalorder %s17_s16, %s360_s24  ;;  %p365_p4 = scmp.lt.s32.totalorder %s17_s16, %s17_s16 }
   0xb   :  { %p366_p5 = scmp.lt.s32.totalorder %s364_s25, %s360_s24 }
   0xd   :  { %p367_p6 = por %p366_p5, %p365_p4 }
   0xf   :  { %p368_p7 = pnand %p367_p6, %p361_p3 }
  0x11   :  { %371 = shalt.err (!%p368_p7)
}
  0x12   :  { %s399_s26 = smov 128   ;;  %s400_s27 = smov 8  }
  0x13   :  { %22 = dma.hbm_to_vmem [thread:$0]  %s490_s0, 384, %s17_s16, [#allocation3], %s399_s26, %s399_s26, %s400_s27  }
  0x14   :  { %394 = dma.done.wait [#allocation3], 2048  }
  0x15   :  { %395 = vsyncadd [#allocation3], 4294965248  ;;  %v401_v0 = vmov 0.0|0.0   ;;  %vm402_vm0 = vmmov 0   ;;  %v403_v1 = vmov 0.0   ;;  %v404_v2 = vmov 0  }
  0x16   :  { %305 = vmatprep.subr.bf16.mxu0 %v401_v0  ;;  %302 = vmatprep.mubr.msk.f32.mxu0 %vm402_vm0, %v403_v1  ;;  %vm55_vm1 = vcmask 261120   ;;  %v32_v3 = vld [vmem:[#allocation2] sm:$0xff]  ;;  %v33_v4 = vld [vmem:[#allocation2 + $0x8] sm:$0xff]  ;;  %v34_v7 = vld [vmem:[#allocation2 + $0x10] sm:$0xff]  ;;  %vm177_vm3 = vcmask 1043456   ;;  %v200_v51 = vlaneseq  ;;  %s405_s7 = smov [#allocation5]  }
  0x17   :  { %345 = vset.pattern.permute.xlu0 %v404_v2  ;;  %vm445_vm2 = vmpackc.low %vm55_vm1, %vm55_vm1  ;;  %v306_v6 = vpack.c.bf16 %v33_v4, %v32_v3  ;;  %v35_v8 = vld [vmem:[#allocation2 + $0x18] sm:$0xff]  ;;  %v49_v9 = vld [vmem:[%s492_s2] sm:$0xf]  ;;  %s226_s8 = sshll.u32 %s405_s7, 4  ;;  %vm218_vm5 = vcmask 0   ;;  %s227_s8 = int_to_ptr.vmem [resolvable:$true] %s226_s8 }
  0x18   :  { %52 = vperm.xlu0 %345, %v49_v9   ;;  %v310_v10 = vpack.c.bf16 %v35_v8, %v34_v7  ;;  %v36_v11 = vld [vmem:[#allocation2 + $0x20] sm:$0xff]  ;;  %v37_v12 = vld [vmem:[#allocation2 + $0x28] sm:$0xff]  ;;  %v38_v14 = vld [vmem:[#allocation2 + $0x30] sm:$0xff]  ;;  %v201_v53 = vshrl.u32 %v200_v51, 7  ;;  %s376_s9 = scalar_lea.vmem %s227_s8, 32  ;;  %p377_p9 = scmp.lt.s32.totalorder %s227_s8, %s227_s8 }
  0x19   :  { %308 = vmatpush3.bf16.xpose.msk.msra.mxu0 %vm445_vm2, %v306_v6  ;;  %v314_v13 = vpack.c.bf16 %v37_v12, %v36_v11  ;;  %v39_v15 = vld [vmem:[#allocation2 + $0x38] sm:$0xff]  ;;  %v40_v17 = vld [vmem:[#allocation2 + $0x40] sm:$0xff]  ;;  %v41_v18 = vld [vmem:[#allocation2 + $0x48] sm:$0xff] }
  0x1a   :  { %309 = vmatprep.subr.bf16.mxu0 %v401_v0  ;;  %v318_v16 = vpack.c.bf16 %v39_v15, %v38_v14  ;;  %v322_v19 = vpack.c.bf16 %v41_v18, %v40_v17  ;;  %v42_v20 = vld [vmem:[#allocation2 + $0x50] sm:$0xff]  ;;  %v43_v21 = vld [vmem:[#allocation2 + $0x58] sm:$0xff]  ;;  %v44_v23 = vld [vmem:[#allocation2 + $0x60] sm:$0xff] }
  0x1b   :  { %v326_v22 = vpack.c.bf16 %v43_v21, %v42_v20  ;;  %v45_v24 = vld [vmem:[#allocation2 + $0x68] sm:$0xff]  ;;  %v46_v26 = vld [vmem:[#allocation2 + $0x70] sm:$0xff]  ;;  %v47_v27 = vld [vmem:[#allocation2 + $0x78] sm:$0xff] }
  0x1c   :  { %v330_v25 = vpack.c.bf16 %v45_v24, %v44_v23  ;;  %v334_v28 = vpack.c.bf16 %v47_v27, %v46_v26  ;;  %v48_v29 = vld [vmem:[%s491_s1] sm:$0xf] }
  0x1d   :  { %v252_v55 = vld [vmem:[%s493_s3] ss:$0 sm:$0xff]  ;;  %s372_s3 = scalar_lea.vmem %s227_s8, 16 }
  0x1e   :  { %vm206_vm4 = vcmp.eq.s32.totalorder %v201_v53, %v252_v55  ;;  %p373_p8 = scmp.ne.s32.totalorder %s227_s8, %s372_s3  ;;  %p378_p10 = scmp.lt.s32.totalorder %s376_s9, %s372_s3 }
  0x20   :  { %p379_p11 = por %p378_p10, %p377_p9 }
  0x21   :  { %312 = vmatpush3.bf16.xpose.msk.msra.mxu0 %vm445_vm2, %v310_v10 }
  0x22   :  { %313 = vmatprep.subr.bf16.mxu0 %v401_v0  ;;  %p380_p12 = pnand %p379_p11, %p373_p8 }
  0x29   :  { %316 = vmatpush3.bf16.xpose.msk.msra.mxu0 %vm445_vm2, %v314_v13 }
  0x2a   :  { %317 = vmatprep.subr.bf16.mxu0 %v401_v0 }
  0x31   :  { %320 = vmatpush3.bf16.xpose.msk.msra.mxu0 %vm445_vm2, %v318_v16 }
  0x32   :  { %321 = vmatprep.subr.bf16.mxu0 %v401_v0 }
  0x39   :  { %324 = vmatpush3.bf16.xpose.msk.msra.mxu0 %vm445_vm2, %v322_v19 }
  0x3a   :  { %325 = vmatprep.subr.bf16.mxu0 %v401_v0 }
  0x41   :  { %328 = vmatpush3.bf16.xpose.msk.msra.mxu0 %vm445_vm2, %v326_v22 }
  0x42   :  { %329 = vmatprep.subr.bf16.mxu0 %v401_v0 }
  0x49   :  { %332 = vmatpush3.bf16.xpose.msk.msra.mxu0 %vm445_vm2, %v330_v25 }
  0x4a   :  { %333 = vmatprep.subr.bf16.mxu0 %v401_v0 }
  0x51   :  { %336 = vmatpush3.bf16.xpose.msk.msra.mxu0 %vm445_vm2, %v334_v28 }
  0x58   :  { %303 = vmatmul.mubr.msk.f32.vlgmr.msra.gmra.mrb[0].mxu0 %vm55_vm1, %v48_v29 }
  0x97   :  { %v53_v30 = vpop.permute.xlu0 %52 }
 0x12b   :  { %v173_v31 = vpop.f32.mrb[0].mxu0 }
 0x12c   :  { %v174_v32 = vadd.f32 %v173_v31, %v53_v30  ;;  %v304_v33 = vpop.f32.mrb[1].mxu0 }
 0x12e   :  { %v178_v34 = vsel %vm177_vm3, %v174_v32, -inf }
 0x12f   :  { %v179_v35 = vrot.slane %v178_v34, 4 }
 0x131   :  { %v180_v36 = vmax.f32 %v178_v34, %v179_v35 }
 0x133   :  { %v181_v37 = vrot.slane %v180_v36, 2 }
 0x135   :  { %v182_v38 = vmax.f32 %v180_v36, %v181_v37 }
 0x137   :  { %v183_v39 = vrot.slane %v182_v38, 1 }
 0x139   :  { %v184_v40 = vmax.f32 %v182_v38, %v183_v39 }
 0x13b   :  { %v185_v41 = vsub.f32 %v174_v32, %v184_v40 }
 0x13d   :  { %v186_v42 = vmul.f32 1.442695, %v185_v41 }
 0x13f   :  { %346 = vpow2.f32 %v186_v42 }
 0x149   :  { %v347_v43 = vpop.eup %346 }
 0x14a   :  { %v188_v44 = vsel %vm177_vm3, %v347_v43, 0.0 }
 0x14b   :  { %v189_v45 = vrot.slane %v188_v44, 4 }
 0x14d   :  { %v190_v46 = vadd.f32 %v189_v45, %v188_v44 }
 0x14f   :  { %v191_v47 = vrot.slane %v190_v46, 2 }
 0x151   :  { %v192_v48 = vadd.f32 %v191_v47, %v190_v46 }
 0x153   :  { %v193_v49 = vrot.slane %v192_v48, 1 }
 0x155   :  { %v194_v50 = vadd.f32 %v193_v49, %v192_v48 }
 0x157   :  { %348 = vlog2.f32 %v194_v50 }
 0x161   :  { %v349_v52 = vpop.eup %348 }
 0x162   :  { %v196_v54 = vmul.f32 0.6931472, %v349_v52 }
 0x164   :  { %v197_v56 = vadd.f32 %v196_v54, %v184_v40 }
 0x166   :  { %v198_v57 = vsub.f32 %v174_v32, %v197_v56 }
 0x168   :  { %v207_v58 = vsel %vm206_vm4, %v198_v57, 0.0 }
 0x169   :  { %v208_v59 = vsel %vm177_vm3, %v207_v58, 0.0 }
 0x16a   :  { %v209_v60 = vrot.slane %v208_v59, 4 }
 0x16c   :  { %v210_v61 = vadd.f32 %v209_v60, %v208_v59 }
 0x16e   :  { %v211_v62 = vrot.slane %v210_v61, 2 }
 0x170   :  { %v212_v63 = vadd.f32 %v211_v62, %v210_v61 }
 0x172   :  { %v213_v0 = vrot.slane %v212_v63, 1 }
 0x174   :  { %v214_v1 = vadd.f32 %v213_v0, %v212_v63 }
 0x176   :  { %215 = vadd.xlane.f32.xlu0 %v214_v1 }
 0x203   :  { %v216_v2 = vpop.xlane.xlu0 %215 }
 0x204   :  { %v217_v3 = vsub.f32 0.0, %v216_v2 }
 0x206   :  { %219 = vst.msk [vmem:[#allocation5] sm:$0x1] %vm218_vm5, %v217_v3 }
 0x207   :  { %383 = shalt.err (!%p380_p12)
}
 0x208   :  { %s384_s12 = scalar_lea.hbm %s494_s4, 16 }
 0x209   :  { %p385_p13 = scmp.ne.s32.totalorder %s494_s4, %s384_s12  ;;  %p388_p0 = scmp.lt.u32.totalorder %s384_s12, %s494_s4 }
 0x20b   :  { %p390_p1 = pnand %p388_p0, %p385_p13 }
 0x20d   :  { %393 = shalt.err (!%p390_p1)
}
 0x20e   :  { %229 = dma.vmem_to_hbm [thread:$0]  %s227_s8, 16, %s494_s4, [#allocation4]  }
 0x20f   :  { %396 = dma.done.wait [#allocation4], 16  }
 0x210   :  { %397 = vsyncadd [#allocation4], 4294967280 }
 0x211   :  { %233 = vsyncpa [#allocation3], 1 }
 0x212   :  { %234 = vsyncpa [#allocation4], 1 }

</bundles_post_ra>
